<compile_context>
chip_gen: v7x
topology: tpu7x:2x2x1
jax: 0.10.0
libtpu: 0.0.40
codegen_flags: <defaults>
</compile_context>

<pallas_src>
import jax
import jax.numpy as jnp
import numpy as np
from jax.experimental import pallas as pl
from jax.experimental.pallas import tpu as pltpu


def bln_attn_kernel(x_ref, wy_ref, out_ref):
    # x_ref:   (TB, L, Dxp)  block of batch rows, source dtype (no f32 copy)
    # wy_ref:  (TB, 1, Dxp)  precomputed y @ W^T + b, f32
    # out_ref: (TB, L, Dxp)
    x = x_ref[...]          # keep source dtype end-to-end
    wy = wy_ref[...]        # f32

    # scores_i = <x_i, Wy>  — VPU multiply + lane (XLU) reduce, f32 accumulation.
    scores = jnp.sum(x * wy, axis=-1, keepdims=True)          # (TB, L, 1) f32

    # softmax over the sequence (len) axis
    m = jnp.max(scores, axis=1, keepdims=True)                 # (TB, 1, 1)
    e = jnp.exp(scores - m)                                    # (TB, L, 1)
    denom = jnp.sum(e, axis=1, keepdims=True)                  # (TB, 1, 1)
    alpha = e * pl.reciprocal(denom, approx=True)              # EUP reciprocal (free slot)

    # alpha.unsqueeze(2) * x ; alpha is tiny, cast it to x's dtype, not x to f32.
    out_ref[...] = (alpha.astype(x.dtype) * x).astype(out_ref.dtype)


def bilinear_attn(x, y, w, b):
    """x: (B, L, Dx), y: (B, Dy), w: (Dx, Dy), b: (Dx,) -> (B, L, Dx)"""
    B, L, Dx = x.shape

    # Hoist the linear layer: one XLA GEMM instead of an M=1 matmul per grid step.
    wy = (y.astype(jnp.float32) @ w.astype(jnp.float32).T
          + b.astype(jnp.float32))                              # (B, Dx) f32

    # Pad the feature axis to a multiple of 128 so the output store is lane-dense
    # (unmasked vst). Padding is zeros, so scores and the sliced output are exact.
    Dxp = ((Dx + 127) // 128) * 128
    if Dxp != Dx:
        x_p = jnp.pad(x, ((0, 0), (0, 0), (0, Dxp - Dx)))
        wy_p = jnp.pad(wy, ((0, 0), (0, Dxp - Dx)))
    else:
        x_p, wy_p = x, wy
    wy_p = wy_p.reshape(B, 1, Dxp)

    # Pick a batch-tile TB (divisor of B): aim for ~2 MiB of x per block (near HBM
    # roofline), but keep >=2 grid steps when B allows so both v7x TCs get work.
    itemsize = jnp.dtype(x.dtype).itemsize
    target_bytes = 2 << 20
    divisors = [d for d in range(1, B + 1) if B % d == 0]
    fitting = [d for d in divisors if d * L * Dxp * itemsize <= target_bytes] or [1]
    cands = [d for d in fitting if B // d >= 2] or fitting
    TB = max(cands)
    grid = (B // TB,)

    # Double-buffered x-in + out, wy blocks and f32 temporaries, plus headroom.
    block_bytes = TB * L * Dxp * itemsize
    vmem_limit = int(min(max(6 * block_bytes + (4 << 20), 16 << 20), 48 << 20))

    grid_spec = pltpu.PrefetchScalarGridSpec(
        num_scalar_prefetch=0,
        grid=grid,
        in_specs=[
            pl.BlockSpec((TB, L, Dxp), lambda i: (i, 0, 0)),   # x block (TB batch rows)
            pl.BlockSpec((TB, 1, Dxp), lambda i: (i, 0, 0)),   # wy block
        ],
        out_specs=pl.BlockSpec((TB, L, Dxp), lambda i: (i, 0, 0)),
    )

    out = pl.pallas_call(
        bln_attn_kernel,
        out_shape=jax.ShapeDtypeStruct((B, L, Dxp), x.dtype),
        grid_spec=grid_spec,
        compiler_params=pltpu.CompilerParams(
            dimension_semantics=("parallel",),
            vmem_limit_bytes=vmem_limit,
        ),
    )(x_p, wy_p)

    if Dxp != Dx:
        out = out[:, :, :Dx]
    return out


def reference(x, y, w, b):
    wy = y @ w.T + b                          # (B, Dx)
    scores = jnp.einsum("bld,bd->bl", x, wy)  # (B, L)
    alpha = jax.nn.softmax(scores, axis=1)    # softmax over len
    return alpha[:, :, None] * x


if __name__ == "__main__":
    key = jax.random.PRNGKey(0)
    k1, k2, k3, k4 = jax.random.split(key, 4)

    B, L, Dx, Dy = 2, 8, 32, 16
    x = jax.random.normal(k1, (B, L, Dx), dtype=jnp.float32)
    y = jax.random.normal(k2, (B, Dy), dtype=jnp.float32)

    # nn.Linear(y_size=Dy, x_size=Dx): weight (Dx, Dy), bias (Dx,)
    bound = 1.0 / np.sqrt(Dy)
    w = jax.random.uniform(k3, (Dx, Dy), minval=-bound, maxval=bound, dtype=jnp.float32)
    bias = jax.random.uniform(k4, (Dx,), minval=-bound, maxval=bound, dtype=jnp.float32)

    out = bilinear_attn(x, y, w, bias)
    out = jax.block_until_ready(out)

    ref = reference(x, y, w, bias)
    # Tolerance covers the EUP approximate reciprocal used for softmax normalization.
    np.testing.assert_allclose(np.asarray(out), np.asarray(ref), rtol=2e-3, atol=2e-3)

    print("KERNEL_OK")
</pallas_src>

<mosaic_0001>
module attributes {stable_mosaic.version = 11 : i64} {
  func.func @bln_attn_kernel(%arg0: i32, %arg1: memref<1x8x128xf32, #tpu.memory_space<vmem>>, %arg2: memref<1x1x128xf32, #tpu.memory_space<vmem>>, %arg3: memref<1x8x128xf32, #tpu.memory_space<vmem>>) attributes {dimension_semantics = [#tpu.dimension_semantics<parallel>], iteration_bounds = array<i64: 2>, scalar_prefetch = 0 : i64, scratch_operands = 0 : i64, tpu.core_type = #tpu.core_type<tc>, window_params = [{transform_indices = @transform_0, window_bounds = array<i64: 1, 8, 128>}, {transform_indices = @transform_1, window_bounds = array<i64: 1, 1, 128>}, {transform_indices = @transform_2, window_bounds = array<i64: 1, 8, 128>}]} {
    %c0 = arith.constant 0 : index
    %c0_0 = arith.constant 0 : index
    %c0_1 = arith.constant 0 : index
    %0 = vector.load %arg1[%c0, %c0_0, %c0_1] : memref<1x8x128xf32, #tpu.memory_space<vmem>>, vector<1x8x128xf32>
    %c0_2 = arith.constant 0 : index
    %c0_3 = arith.constant 0 : index
    %c0_4 = arith.constant 0 : index
    %1 = vector.load %arg2[%c0_2, %c0_3, %c0_4] : memref<1x1x128xf32, #tpu.memory_space<vmem>>, vector<1x1x128xf32>
    %2 = vector.broadcast %1 : vector<1x1x128xf32> to vector<1x8x128xf32>
    %3 = arith.mulf %0, %2 : vector<1x8x128xf32>
    %cst = arith.constant dense<0.000000e+00> : vector<1x8xf32>
    %4 = vector.multi_reduction <add>, %3, %cst [2] : vector<1x8x128xf32> to vector<1x8xf32>
    %5 = vector.shape_cast %4 : vector<1x8xf32> to vector<1x8x1xf32>
    %cst_5 = arith.constant dense<0xFF800000> : vector<1x1xf32>
    %6 = vector.multi_reduction <maximumf>, %5, %cst_5 [1] : vector<1x8x1xf32> to vector<1x1xf32>
    %7 = vector.shape_cast %6 : vector<1x1xf32> to vector<1x1x1xf32>
    %8 = vector.broadcast %7 : vector<1x1x1xf32> to vector<1x8x1xf32>
    %9 = arith.subf %5, %8 : vector<1x8x1xf32>
    %10 = math.exp %9 : vector<1x8x1xf32>
    %cst_6 = arith.constant dense<0.000000e+00> : vector<1x1xf32>
    %11 = vector.multi_reduction <add>, %10, %cst_6 [1] : vector<1x8x1xf32> to vector<1x1xf32>
    %12 = vector.shape_cast %11 : vector<1x1xf32> to vector<1x1x1xf32>
    %13 = tpu.reciprocal %12 {approx = true} : vector<1x1x1xf32> -> vector<1x1x1xf32>
    %14 = vector.broadcast %13 : vector<1x1x1xf32> to vector<1x8x1xf32>
    %15 = arith.mulf %10, %14 : vector<1x8x1xf32>
    %16 = vector.broadcast %15 : vector<1x8x1xf32> to vector<1x8x128xf32>
    %17 = arith.mulf %16, %0 : vector<1x8x128xf32>
    %c0_7 = arith.constant 0 : index
    %c0_8 = arith.constant 0 : index
    %c0_9 = arith.constant 0 : index
    %18 = vector.load %arg3[%c0_7, %c0_8, %c0_9] : memref<1x8x128xf32, #tpu.memory_space<vmem>>, vector<1x8x128xf32>
    tpu.vector_store %arg3[%c0_7, %c0_8, %c0_9], %17 {strides = array<i32>} : memref<1x8x128xf32, #tpu.memory_space<vmem>>, vector<1x8x128xf32>,
    return
  }
  func.func @transform_0(%arg0: i32) -> (i32, i32, i32) {
    %c0_i32 = arith.constant 0 : i32
    %c0_i32_0 = arith.constant 0 : i32
    %c0_i32_1 = arith.constant 0 : i32
    return %arg0, %c0_i32, %c0_i32_0 : i32, i32, i32
  }
  func.func @transform_1(%arg0: i32) -> (i32, i32, i32) {
    %c0_i32 = arith.constant 0 : i32
    %c0_i32_0 = arith.constant 0 : i32
    %c0_i32_1 = arith.constant 0 : i32
    return %arg0, %c0_i32, %c0_i32_0 : i32, i32, i32
  }
  func.func @transform_2(%arg0: i32) -> (i32, i32, i32) {
    %c0_i32 = arith.constant 0 : i32
    %c0_i32_0 = arith.constant 0 : i32
    %c0_i32_1 = arith.constant 0 : i32
    return %arg0, %c0_i32, %c0_i32_0 : i32, i32, i32
  }
}

</mosaic_0001>

<bundles_post_ra>
// kernel: tpu_custom_call.1
= control target key start
LH: loop header
LB: loop body
LE: loop exit
PB: predicated region body
PF: predicated region fallthrough
CT: control target
= control target key end

     0   :  { %7 = vsyncpa [#allocation3], 0  ;;  %s644_s0 = inlined_call_operand.hbm [shape: f32[2,8,128], index: 0, kind: input, shape index: {}]   ;;  %s645_s1 = inlined_call_operand.vmem [shape: f32[2,1,128], index: 1, kind: input, shape index: {}]   ;;  %s646_s2 = inlined_call_operand.hbm [shape: f32[2,8,128], index: 2, kind: output, shape index: {}]  }
   0x1   :  { %9 = vsyncpa [#allocation3 + $0x1], 0 }
   0x2   :  { %10 = vsyncpa [#allocation4], 0 }
   0x3   :  { %12 = vsyncpa [#allocation4 + $0x1], 0  ;;  %s474_s9 = smov 0   ;;  %s476_s10 = smov 0  }
   0x4   :  { %s478_s11 = smov 0   ;;  %s480_s12 = smov 0  }
   0x5 LB: > { %s495_s13 = sadd.s32 4294967295, %s455_s12   ;;  %s296_s14 = sadd.s32 4294967294, %s455_s12   ;;  %s455_s12 = sphi %s480_s12, %s661_s12   ;;  %s451_s11 = sphi %s478_s11, %s660_s11   ;;  %s447_s10 = sphi %s476_s10, %s659_s10   ;;  %s443_s9 = sphi %s474_s9, %s658_s9  }
   0x6   : > { %s499_s15 = sadd.s32 1, %s455_s12   ;;  %s25_s16 = sadd.s32 1, %s451_s11 }
   0x7   : > { %s22_s17 = ssub.s32 %s455_s12, %s499_s15  ;;  %p32_p0 = scmp.ne.s32.totalorder %s451_s11, %s447_s10 }
   0x8   : > { %p23_p1 = scmp.eq.s32.totalorder %s22_s17, 0  ;;  %p33_p2 = scmp.eq.s32.totalorder %s455_s12, 0 }
   0x9   : > { %p38_p3 = scmp.ne.s32.totalorder %s447_s10, %s443_s9  ;;  %p39_p4 = scmp.eq.s32.totalorder %s495_s13, 0 }
   0xa   : > { %s511_s18 = scalar_select %p23_p1, %s451_s11, %s25_s16  }
   0xb   : > { %p513_p5 = por %p33_p2, %p32_p0  ;;  %p517_p6 = por %p39_p4, %p38_p3 }
   0xc   : > { %p88_p7 = scmp.eq.s32.totalorder %s495_s13, 1  ;;  %p94_p8 = scmp.eq.s32.totalorder %s296_s14, 1 }
   0xd   : > { %p321_p10 = scmp.lt.s32.totalorder %s455_s12, 2  ;;  %s114_s23 = sand.u32 1, %s451_s11  }
   0xe   : > { %p524_p11 = por %p88_p7, %p32_p0  ;;  %p528_p12 = por %p94_p8, %p38_p3 }
   0xf   : > { %s300_s24 = sshll.u32 %s455_s12, 7  ;;  %s299_s25 = sshll.u32 %s114_s23, 3 }
  0x10   : > { %s650_s21 = scalar_select %p524_p11, 1, 0 }
  0x11   : > { %s651_s22 = scalar_select %p528_p12, 1, 0 }
  0x12   : > { %s537_s28 = scalar_lea.hbm %s644_s0, %s300_s24  ;;  %s118_s29 = scalar_lea.vmem [#allocation2], %s299_s25 }
  0x13   : > { %s125_s30 = sshll.u32 %s118_s29, 4  ;;  %p541_p13 = pnand %p321_p10, %p513_p5  ;;  %s545_s30 = int_to_ptr.vmem [resolvable:$true] %s125_s30 }
  0x14   : > { %s115_s4 = scalar_lea.sflag [#allocation3], %s114_s23  ;;  %s359_s5 = scalar_lea.hbm %s537_s28, 128 }
  0x15   : > { %p360_p2 = scmp.ne.s32.totalorder %s537_s28, %s359_s5  ;;  %p361_p3 = pneg %p541_p13 }
  0x16   : > { %s364_s8 = scalar_lea.hbm %s644_s0, 256  ;;  %p365_p5 = scmp.lt.u32.totalorder %s537_s28, %s644_s0 }
  0x17   : > { %p362_p4 = pnand %p361_p3, %p360_p2  ;;  %p366_p8 = scmp.lt.u32.totalorder %s364_s8, %s359_s5 }
  0x18   : > { %p368_p9 = scmp.lt.u32.totalorder %s359_s5, %s537_s28 }
  0x19   : > { %p363_p7 = pneg %p362_p4  ;;  %p367_p10 = por %p366_p8, %p365_p5 }
  0x1b   : > { %p369_p0 = por %p368_p9, %p367_p10 }
  0x1d   : > { %p370_p1 = pnand %p369_p0, %p363_p7 }
  0x1f   : > { %373 = shalt.err (!%p370_p1)
}
  0x20   : > { %s374_s17 = scalar_lea.vmem %s545_s30, 128  ;;  %s457_s19 = smov [#allocation2]  }
  0x21   : > { %p375_p2 = scmp.ne.s32.totalorder %s545_s30, %s374_s17  ;;  %s379_s23 = sshll.u32 %s457_s19, 4  ;;  %s380_s23 = int_to_ptr.vmem [resolvable:$false] %s379_s23 }
  0x22   : > { %s381_s24 = scalar_lea.vmem %s380_s23, 256  ;;  %p382_p11 = scmp.lt.s32.totalorder %s545_s30, %s380_s23 }
  0x23   : > { %p377_p4 = pnand %p375_p2, %p361_p3  ;;  %p383_p5 = scmp.lt.s32.totalorder %s381_s24, %s374_s17 }
  0x25   : > { %p378_p12 = pneg %p377_p4  ;;  %p384_p8 = por %p383_p5, %p382_p11 }
  0x27   : > { %p385_p9 = pnand %p384_p8, %p378_p12 }
  0x29   : > { %388 = shalt.err (!%p385_p9)
}
  0x2a   : > { %316 = dma.hbm_to_vmem [thread:$0]  (!%p541_p13), %s537_s28, 128, %s545_s30, %s115_s4  }
  0x2b   : > { %p653_p0 = scmp.lt.s32.totalorder %s455_s12, 3  ;;  %p654_p1 = scmp.ge.s32.totalorder %s455_s12, 1 }
  0x2d   : > { %p137_p3 = pnand %p654_p1, %p653_p0 }
  0x2e   : > { %s579_s25 = sand.u32 (!%p137_p3), 1, %s447_s10  }
  0x2f   : > { %140 = sbr.rel (%p137_p3) target bundleno = 273 (0x111), region = 28  ;;  %s302_s26 = sshll.u32 (!%p137_p3), %s579_s25, 3 }
  0x30   : > { %s143_s27 = scalar_lea.sflag (!%p137_p3), [#allocation3], %s579_s25  ;;  %s146_s29 = scalar_lea.vmem (!%p137_p3), [#allocation2], %s302_s26 }
  0x36   : > { %434 = dma.done.wait (%p517_p6), %s143_s27, 128  }
  0x37   : > { %436 = vsyncadd (%p517_p6), %s143_s27, 4294967168  ;;  %p170_p11 = scmp.lt.s32.totalorder %s495_s13, 1  ;;  %v173_v0 = vld [vmem:[%s146_s29] sm:$0xff]  ;;  %s306_s20 = sshll.u32 %s495_s13, 7 }
  0x38   : > { %s169_s5 = scalar_lea.vmem [#allocation5], %s302_s26  ;;  %s600_s14 = scalar_lea.hbm %s646_s2, %s306_s20 }
  0x39   : > { %s171_s28 = scalar_select %p170_p11, %s495_s13, 1 }
  0x3a   : > { %s217_s6 = sshll.u32 %s169_s5, 4  ;;  %s204_s16 = scalar_lea.sflag [#allocation4], %s579_s25  ;;  %s602_s6 = int_to_ptr.vmem [resolvable:$true] %s217_s6 }
  0x3b   : > { %s172_s4 = scalar_lea.vmem %s645_s1, %s171_s28  ;;  %s389_s17 = scalar_lea.vmem %s602_s6, 128 }
  0x3c   : > { %v304_v1 = vld [vmem:[%s172_s4] ss:$0 sm:$0xff]  ;;  %p390_p6 = scmp.ne.s32.totalorder %s602_s6, %s389_s17  ;;  %p655_p12 = scmp.ne.s32.totalorder %s650_s21, 0 }
  0x3d   : > { %v181_v2 = vmul.f32 %v304_v1, %v173_v0  ;;  %s458_s13 = smov [#allocation5]  }
  0x3e   : > { %p391_p13 = pnand %p390_p6, %p655_p12  ;;  %s393_s19 = sshll.u32 %s458_s13, 4  ;;  %s394_s19 = int_to_ptr.vmem [resolvable:$false] %s393_s19 }
  0x3f   : > { %182 = vadd.xlane.f32.xlu0 %v181_v2  ;;  %s395_s23 = scalar_lea.vmem %s394_s19, 256  ;;  %p396_p10 = scmp.lt.s32.totalorder %s602_s6, %s394_s19 }
  0x40   : > { %p392_p7 = pneg %p391_p13  ;;  %p397_p2 = scmp.lt.s32.totalorder %s395_s23, %s389_s17 }
  0x42   : > { %p398_p4 = por %p397_p2, %p396_p10 }
  0x44   : > { %p399_p5 = pnand %p398_p4, %p392_p7 }
  0xcc   : > { %v183_v3 = vpop.xlane.xlu0 %182 }
  0xcd   : > { %v184_v4 = vrot.slane %v183_v3, 4 }
  0xcf   : > { %v185_v5 = vmax.f32 %v183_v3, %v184_v4 }
  0xd1   : > { %v186_v6 = vrot.slane %v185_v5, 2 }
  0xd3   : > { %v187_v7 = vmax.f32 %v185_v5, %v186_v6 }
  0xd5   : > { %v188_v8 = vrot.slane %v187_v7, 1 }
  0xd7   : > { %v189_v9 = vmax.f32 %v187_v7, %v188_v8 }
  0xd9   : > { %v190_v10 = vsub.f32 %v183_v3, %v189_v9 }
  0xdb   : > { %v191_v11 = vmul.f32 1.442695, %v190_v10 }
  0xdd   : > { %355 = vpow2.f32 %v191_v11 }
  0xe7   : > { %v356_v12 = vpop.eup %355 }
  0xe8   : > { %v193_v13 = vrot.slane %v356_v12, 4 }
  0xea   : > { %v194_v14 = vadd.f32 %v356_v12, %v193_v13 }
  0xec   : > { %v195_v15 = vrot.slane %v194_v14, 2 }
  0xee   : > { %v196_v16 = vadd.f32 %v195_v15, %v194_v14 }
  0xf0   : > { %v197_v17 = vrot.slane %v196_v16, 1 }
  0xf2   : > { %v198_v18 = vadd.f32 %v197_v17, %v196_v16 }
  0xf4   : > { %357 = vrcp.f32 %v198_v18 }
  0xfe   : > { %v358_v19 = vpop.eup %357 }
  0xff   : > { %v200_v20 = vmul.f32 %v358_v19, %v356_v12 }
 0x101   : > { %v201_v21 = vmul.f32 %v200_v20, %v173_v0 }
 0x103   : > { %202 = vst [vmem:[%s169_s5] sm:$0xff] %v201_v21 }
 0x104   : > { %402 = shalt.err (!%p399_p5)
}
 0x105   : > { %s403_s24 = scalar_lea.hbm %s600_s14, 128  ;;  %s407_s27 = scalar_lea.hbm %s646_s2, 256 }
 0x106   : > { %p404_p8 = scmp.ne.s32.totalorder %s600_s14, %s403_s24  ;;  %p408_p1 = scmp.lt.u32.totalorder %s600_s14, %s646_s2 }
 0x107   : > { %p409_p3 = scmp.lt.u32.totalorder %s407_s27, %s403_s24  ;;  %p411_p6 = scmp.lt.u32.totalorder %s403_s24, %s600_s14 }
 0x108   : > { %p405_p9 = pnand %p404_p8, %p655_p12 }
 0x109   : > { %p410_p11 = por %p409_p3, %p408_p1 }
 0x10a   : > { %p406_p0 = pneg %p405_p9 }
 0x10b   : > { %p412_p13 = por %p411_p6, %p410_p11 }
 0x10d   : > { %p413_p7 = pnand %p412_p13, %p406_p0 }
 0x10f   : > { %416 = shalt.err (!%p413_p7)
}
 0x110   : > { %311 = dma.vmem_to_hbm [thread:$0]  (%p655_p12), %s602_s6, 128, %s600_s14, %s204_s16  }
 0x111 PF: > { %s229_s30 = sand.u32 1, %s443_s9   ;;  %p656_p10 = scmp.ne.s32.totalorder %s651_s22, 0 }
 0x112   : > { %p657_p2 = scmp.ge.s32.totalorder %s455_s12, 2  ;;  %s230_s3 = scalar_lea.sflag [#allocation4], %s229_s30 }
 0x114   : > { %p318_p4 = pnand %p657_p2, %p656_p10 }
 0x116   : > { %438 = dma.done.wait (!%p318_p4), %s230_s3, 128  }
 0x117   : > { %440 = vsyncadd (!%p318_p4), %s230_s3, 4294967168  ;;  %p15_p5 = scmp.ge.s32.totalorder %s499_s15, 4   ;;  %s658_s9 = smov %s447_s10 }
 0x118   : > { %s659_s10 = smov %s451_s11  ;;  %s660_s11 = smov %s511_s18 }
 0x119   : > { %s661_s12 = smov %s499_s15  ;;  %17 = sbr.rel (!%p15_p5) target bundleno = 5 (0x5), region = 76 }
 0x120   :  { %235 = vsyncpa [#allocation3], 1 }
 0x121   :  { %237 = vsyncpa [#allocation3 + $0x1], 1 }
 0x122   :  { %238 = vsyncpa [#allocation4], 1 }
 0x123   :  { %240 = vsyncpa [#allocation4 + $0x1], 1 }

</bundles_post_ra>
